<compile_context>
chip_gen: v7x
topology: tpu7x:2x2x1
jax: 0.10.0
libtpu: 0.0.40
codegen_flags: <defaults>
</compile_context>

<pallas_src>
import jax
import jax.numpy as jnp
from jax.experimental import pallas as pl
from jax.experimental.pallas import tpu as pltpu


# ----------------------------------------------------------------------------
# Kernel: one (TM, K) x (K, N) tile matmul + bias, f32 accumulation on the MXU.
# ----------------------------------------------------------------------------
def _linear_kernel(x_ref, w_ref, b_ref, o_ref):
    # x_ref: (TM, K)  w_ref: (K, N)  b_ref: (1, N)  o_ref: (TM, N)   (all VMEM)
    acc = jnp.dot(x_ref[...], w_ref[...], preferred_element_type=jnp.float32)
    o_ref[...] = (acc + b_ref[...]).astype(o_ref.dtype)


def _round_up(x, m):
    return ((x + m - 1) // m) * m


def _choose_tm(n_rows, step_row_bytes, *, target_bytes=4 << 20, tm_max=4096,
               min_steps=8):
    """Row-tile for the streaming axis.

    - budget on input-row + output-row bytes (both streams are double-buffered)
    - keep >= min_steps grid steps so the 1-D "parallel" axis can shard across
      TensorCores (v7x) and the pipeline has work to overlap
    - multiple of 8 sublanes, or the full extent for tiny inputs
    """
    if n_rows <= 8:
        return max(n_rows, 1)                         # single full-extent block
    tm = (target_bytes // max(step_row_bytes, 1)) // 8 * 8
    tm = max(8, min(tm, tm_max))
    tm_cap = _round_up(-(-n_rows // min_steps), 8)    # keep >= min_steps steps
    return max(8, min(tm, tm_cap))


def _tiled_linear(x2d, wt, b2, tm):
    """x2d: (M, K);  wt: (K, N);  b2: (1, N)  ->  (M, N).

    grid = cdiv(M, tm): ragged last block handled by Pallas (OOB input rows are
    garbage, their output rows are masked on writeback), so no jnp.pad copy.
    """
    m, k = x2d.shape
    n = wt.shape[1]
    itemsize = x2d.dtype.itemsize

    # Real footprint: double-buffered in/out tiles + resident weight/bias.
    vmem_need = 2 * tm * (k + n) * itemsize + 2 * (k * n + n) * itemsize
    vmem_limit = int(min(max(vmem_need + (4 << 20), 16 << 20), 40 << 20))

    cost = pl.CostEstimate(
        flops=2 * m * k * n,
        transcendentals=0,
        bytes_accessed=(m * k + m * n + k * n + n) * itemsize,
    )

    return pl.pallas_call(
        _linear_kernel,
        out_shape=jax.ShapeDtypeStruct((m, n), x2d.dtype),
        grid=(pl.cdiv(m, tm),),
        in_specs=[
            # Streamed x tile (double-buffered). If xprof shows exposed DMA on
            # v7x, add pipeline_mode=pl.Buffered(3) here.
            pl.BlockSpec((tm, k), lambda i: (i, 0)),
            pl.BlockSpec((k, n), lambda i: (0, 0)),   # resident across the grid
            pl.BlockSpec((1, n), lambda i: (0, 0)),   # resident across the grid
        ],
        out_specs=pl.BlockSpec((tm, n), lambda i: (i, 0)),
        compiler_params=pltpu.CompilerParams(
            dimension_semantics=("parallel",),
            vmem_limit_bytes=vmem_limit,
        ),
        cost_estimate=cost,
    )(x2d, wt, b2)


# ----------------------------------------------------------------------------
# Factory: hoist the weight/bias layout transforms; return a jitted forward.
# ----------------------------------------------------------------------------
def make_linear_svm(weight, bias, n_feat):
    """weight: (n_classes, n_feat), bias: (n_classes,).  Returns forward(x)."""
    n_classes, k = weight.shape
    assert k == n_feat, (weight.shape, n_feat)
    dtype = weight.dtype
    itemsize = jnp.dtype(dtype).itemsize

    # ---- generic layout: lane-dense output (classes padded to 128). --------
    n_pad = _round_up(n_classes, 128)
    wt_gen = jnp.zeros((n_feat, n_pad), dtype).at[:, :n_classes].set(weight.T)
    b_gen = jnp.zeros((1, n_pad), dtype).at[:, :n_classes].set(bias.astype(dtype))

    # ---- packed layout: r logical rows per 128-lane row, block-diag weight. -
    r = 128 // n_feat if (n_feat <= 128 and 128 % n_feat == 0) else 0
    packed = None
    if r > 1:
        c_pad = n_feat * (-(-n_classes // n_feat))        # r*c_pad % 128 == 0
        if 128 * r * c_pad * itemsize <= (2 << 20):       # keep resident W small
            wt_pad = jnp.zeros((n_feat, c_pad), dtype).at[:, :n_classes].set(weight.T)
            eye = jnp.eye(r, dtype=dtype)
            w_block = jnp.einsum("ij,kc->ikjc", eye, wt_pad).reshape(
                r * n_feat, r * c_pad)
            b_pad = jnp.zeros((c_pad,), dtype).at[:n_classes].set(bias.astype(dtype))
            b_block = jnp.tile(b_pad, r).reshape(1, r * c_pad)
            packed = (w_block, b_block, c_pad)

    def forward(x):
        x2d = x.reshape(-1, n_feat)          # == .contiguous().view(-1, n_feat)
        m = x2d.shape[0]

        if packed is not None and m % r == 0:
            w_block, b_block, c_pad = packed
            m_packed = m // r
            x_packed = x2d.reshape(m_packed, r * n_feat)   # zero-copy (row-major)
            tm = _choose_tm(m_packed, (r * n_feat + r * c_pad) * itemsize)
            out = _tiled_linear(x_packed, w_block, b_block, tm)  # (m_packed, r*c_pad)
            out = out.reshape(m, c_pad)
            return out[:, :n_classes]

        # Generic path: any n_feat, any M (ragged tail handled by partial block).
        tm = _choose_tm(m, (n_feat + n_pad) * itemsize)
        out = _tiled_linear(x2d, wt_gen, b_gen, tm)              # (m, n_pad)
        return out[:, :n_classes]

    return jax.jit(forward)


if __name__ == "__main__":
    # Shapes consistent with the module: x flattens row-major to (-1, n_feat).
    n_feat = 16
    n_classes = 8
    x_shape = (2, 4, 16, 16)   # -> 128 rows of 16 features after view(-1, n_feat)

    key = jax.random.PRNGKey(0)
    kx, kw, kb = jax.random.split(key, 3)

    x = jax.random.normal(kx, x_shape, dtype=jnp.float32)

    # nn.Linear default init: U(-1/sqrt(n_feat), 1/sqrt(n_feat))
    bound = 1.0 / (n_feat ** 0.5)
    weight = jax.random.uniform(kw, (n_classes, n_feat), dtype=jnp.float32,
                                minval=-bound, maxval=bound)
    bias = jax.random.uniform(kb, (n_classes,), dtype=jnp.float32,
                              minval=-bound, maxval=bound)

    svm_forward = make_linear_svm(weight, bias, n_feat)
    y = jax.block_until_ready(svm_forward(x))

    # Reference check against plain JAX.
    ref = x.reshape(-1, n_feat) @ weight.T + bias
    assert y.shape == (128, n_classes), y.shape
    assert jnp.allclose(y, ref, atol=1e-5, rtol=1e-5)

    print("KERNEL_OK")
</pallas_src>

<mosaic_0001>
module attributes {stable_mosaic.version = 11 : i64} {
  func.func @_linear_kernel(%arg0: i32, %arg1: memref<8x128xf32, #tpu.memory_space<vmem>>, %arg2: memref<128x128xf32, #tpu.memory_space<vmem>>, %arg3: memref<1x128xf32, #tpu.memory_space<vmem>>, %arg4: memref<8x128xf32, #tpu.memory_space<vmem>>) attributes {dimension_semantics = [#tpu.dimension_semantics<parallel>], iteration_bounds = array<i64: 2>, scalar_prefetch = 0 : i64, scratch_operands = 0 : i64, tpu.core_type = #tpu.core_type<tc>, window_params = [{transform_indices = @transform_0, window_bounds = array<i64: 8, 128>}, {pipeline_mode = #tpu.pipeline_mode<synchronous>, transform_indices = @transform_1, window_bounds = array<i64: 128, 128>}, {pipeline_mode = #tpu.pipeline_mode<synchronous>, transform_indices = @transform_2, window_bounds = array<i64: 1, 128>}, {transform_indices = @transform_3, window_bounds = array<i64: 8, 128>}]} {
    %c0 = arith.constant 0 : index
    %c0_0 = arith.constant 0 : index
    %0 = vector.load %arg1[%c0, %c0_0] : memref<8x128xf32, #tpu.memory_space<vmem>>, vector<8x128xf32>
    %c0_1 = arith.constant 0 : index
    %c0_2 = arith.constant 0 : index
    %1 = vector.load %arg2[%c0_1, %c0_2] : memref<128x128xf32, #tpu.memory_space<vmem>>, vector<128x128xf32>
    %cst = arith.constant dense<0.000000e+00> : vector<8x128xf32>
    %2 = tpu.matmul %0, %1, %cst {dimension_numbers = #tpu.dot_dimension_numbers<[1], [0], [0], [1], [0, 0, 1, 1], [], []>} : vector<8x128xf32>, vector<128x128xf32>, vector<8x128xf32> -> vector<8x128xf32>
    %c0_3 = arith.constant 0 : index
    %c0_4 = arith.constant 0 : index
    %3 = vector.load %arg3[%c0_3, %c0_4] : memref<1x128xf32, #tpu.memory_space<vmem>>, vector<1x128xf32>
    %4 = vector.broadcast %3 : vector<1x128xf32> to vector<8x128xf32>
    %5 = arith.addf %2, %4 : vector<8x128xf32>
    %c0_5 = arith.constant 0 : index
    %c0_6 = arith.constant 0 : index
    %6 = vector.load %arg4[%c0_5, %c0_6] : memref<8x128xf32, #tpu.memory_space<vmem>>, vector<8x128xf32>
    tpu.vector_store %arg4[%c0_5, %c0_6], %5 {strides = array<i32>} : memref<8x128xf32, #tpu.memory_space<vmem>>, vector<8x128xf32>,
    return
  }
  func.func @transform_0(%arg0: i32) -> (i32, i32) {
    %c0_i32 = arith.constant 0 : i32
    %c0_i32_0 = arith.constant 0 : i32
    return %arg0, %c0_i32 : i32, i32
  }
  func.func @transform_1(%arg0: i32) -> (i32, i32) {
    %c0_i32 = arith.constant 0 : i32
    %c0_i32_0 = arith.constant 0 : i32
    %c0_i32_1 = arith.constant 0 : i32
    return %c0_i32, %c0_i32_0 : i32, i32
  }
  func.func @transform_2(%arg0: i32) -> (i32, i32) {
    %c0_i32 = arith.constant 0 : i32
    %c0_i32_0 = arith.constant 0 : i32
    %c0_i32_1 = arith.constant 0 : i32
    return %c0_i32, %c0_i32_0 : i32, i32
  }
  func.func @transform_3(%arg0: i32) -> (i32, i32) {
    %c0_i32 = arith.constant 0 : i32
    %c0_i32_0 = arith.constant 0 : i32
    return %arg0, %c0_i32 : i32, i32
  }
}

</mosaic_0001>

<bundles_post_ra>
// kernel: forward.1
= control target key start
LH: loop header
LB: loop body
LE: loop exit
PB: predicated region body
PF: predicated region fallthrough
CT: control target
= control target key end

     0   :  { %s442_s12 = smov 0   ;;  %s514_s0 = inlined_call_operand.vmem [shape: f32[16,128], index: 0, kind: input, shape index: {}]   ;;  %s515_s1 = inlined_call_operand.vmem [shape: f32[128,128], index: 1, kind: input, shape index: {}]   ;;  %s516_s2 = inlined_call_operand.vmem [shape: f32[1,128], index: 2, kind: input, shape index: {}]   ;;  %s517_s3 = inlined_call_operand.vmem [shape: f32[16,128], index: 3, kind: output, shape index: {}]  }
   0x1 LB: > { %s314_s13 = sadd.s32 4294967295, %s417_s12   ;;  %p318_p0 = scmp.ge.s32.totalorder %s417_s12, 1  ;;  %s417_s12 = sphi %s442_s12, %s13_s12  }
   0x2   : > { %p136_p1 = scmp.lt.s32.totalorder %s417_s12, 3 }
   0x4   : > { %p137_p2 = pnand %p318_p0, %p136_p1 }
   0x5   : > { %v167_v0 = vld [vmem:[%s515_s1] sm:$0xff] (!%p137_p2)  ;;  %v168_v1 = vld [vmem:[%s515_s1 + $0x8] sm:$0xff] (!%p137_p2)  ;;  %v169_v2 = vld [vmem:[%s515_s1 + $0x10] sm:$0xff] (!%p137_p2)  ;;  %v419_v3 = vmov (!%p137_p2), 0.0|0.0   ;;  %vm420_vm0 = vmmov (!%p137_p2), 0   ;;  %v421_v6 = vmov (!%p137_p2), 0.0  }
   0x6   : > { %140 = sbr.rel (%p137_p2) target bundleno = 254 (0xfe), region = 32  ;;  %376 = vmatprep.subr.bf16.mxu0 (!%p137_p2), %v419_v3  ;;  %v377_v4 = vpack.c.bf16 (!%p137_p2), %v168_v1, %v167_v0  ;;  %v170_v5 = vld [vmem:[%s515_s1 + $0x18] sm:$0xff] (!%p137_p2)  ;;  %373 = vmatprep.mubr.msk.f32.mxu0 (!%p137_p2), %vm420_vm0, %v421_v6  ;;  %v171_v8 = vld [vmem:[%s515_s1 + $0x20] sm:$0xff] (!%p137_p2)  ;;  %v172_v9 = vld [vmem:[%s515_s1 + $0x28] sm:$0xff] (!%p137_p2)  ;;  %p158_p3 = scmp.lt.s32.totalorder (!%p137_p2), %s314_s13, 1 }
   0x7   : > { %v380_v7 = vpack.c.bf16 (!%p137_p2), %v170_v5, %v169_v2  ;;  %v383_v10 = vpack.c.bf16 (!%p137_p2), %v172_v9, %v171_v8  ;;  %v173_v11 = vld [vmem:[%s515_s1 + $0x30] sm:$0xff] (!%p137_p2)  ;;  %v174_v12 = vld [vmem:[%s515_s1 + $0x38] sm:$0xff] (!%p137_p2)  ;;  %v175_v14 = vld [vmem:[%s515_s1 + $0x40] sm:$0xff] (!%p137_p2) }
   0x8   : > { %378 = vmatpush3.bf16.msra.mxu0 (!%p137_p2), %v377_v4  ;;  %v386_v13 = vpack.c.bf16 (!%p137_p2), %v174_v12, %v173_v11  ;;  %v176_v15 = vld [vmem:[%s515_s1 + $0x48] sm:$0xff] (!%p137_p2)  ;;  %v177_v17 = vld [vmem:[%s515_s1 + $0x50] sm:$0xff] (!%p137_p2)  ;;  %v178_v18 = vld [vmem:[%s515_s1 + $0x58] sm:$0xff] (!%p137_p2) }
   0x9   : > { %379 = vmatprep.subr.bf16.mxu0 (!%p137_p2), %v419_v3  ;;  %v389_v16 = vpack.c.bf16 (!%p137_p2), %v176_v15, %v175_v14  ;;  %v392_v19 = vpack.c.bf16 (!%p137_p2), %v178_v18, %v177_v17  ;;  %v179_v20 = vld [vmem:[%s515_s1 + $0x60] sm:$0xff] (!%p137_p2)  ;;  %v180_v21 = vld [vmem:[%s515_s1 + $0x68] sm:$0xff] (!%p137_p2)  ;;  %v181_v23 = vld [vmem:[%s515_s1 + $0x70] sm:$0xff] (!%p137_p2) }
   0xa   : > { %v395_v22 = vpack.c.bf16 (!%p137_p2), %v180_v21, %v179_v20  ;;  %v182_v24 = vld [vmem:[%s515_s1 + $0x78] sm:$0xff] (!%p137_p2)  ;;  %v321_v27 = vld [vmem:[%s516_s2] ss:$0 sm:$0xff] (!%p137_p2) }
   0xb   : > { %v398_v25 = vpack.c.bf16 (!%p137_p2), %v182_v24, %v181_v23 }
   0xc   : > { %381 = vmatpush3.bf16.msra.mxu0 (!%p137_p2), %v380_v7 }
   0xd   : > { %382 = vmatprep.subr.bf16.mxu0 %v419_v3  ;;  %s519_s13 = smov (!%p158_p3, %s314_s13), 1 }
   0xe   : > { %s319_s21 = sshll.u32 %s519_s13, 3 }
   0xf   : > { %s161_s24 = scalar_lea.vmem %s514_s0, %s319_s21  ;;  %s165_s29 = scalar_lea.vmem %s517_s3, %s319_s21 }
  0x10   : > { %384 = vmatpush3.bf16.msra.mxu0 %v383_v10  ;;  %v166_v26 = vld [vmem:[%s161_s24] sm:$0xff] }
  0x11   : > { %385 = vmatprep.subr.bf16.mxu0 %v419_v3 }
  0x14   : > { %387 = vmatpush3.bf16.msra.mxu0 %v386_v13 }
  0x15   : > { %388 = vmatprep.subr.bf16.mxu0 %v419_v3 }
  0x18   : > { %390 = vmatpush3.bf16.msra.mxu0 %v389_v16 }
  0x19   : > { %391 = vmatprep.subr.bf16.mxu0 %v419_v3 }
  0x1c   : > { %393 = vmatpush3.bf16.msra.mxu0 %v392_v19 }
  0x1d   : > { %394 = vmatprep.subr.bf16.mxu0 %v419_v3 }
  0x20   : > { %396 = vmatpush3.bf16.msra.mxu0 %v395_v22 }
  0x21   : > { %397 = vmatprep.subr.bf16.mxu0 %v419_v3 }
  0x24   : > { %399 = vmatpush3.bf16.msra.mxu0 %v398_v25 }
  0x27   : > { %374 = vmatmul.mubr.f32.vlgmr.msra.gmra.mrb[0].mxu0 %v166_v26 }
  0xfa   : > { %v256_v28 = vpop.f32.mrb[0].mxu0 }
  0xfb   : > { %v257_v29 = vadd.f32 %v321_v27, %v256_v28  ;;  %v375_v30 = vpop.f32.mrb[1].mxu0 }
  0xfd   : > { %260 = vst [vmem:[%s165_s29] sm:$0xff] %v257_v29 }
  0xfe PF: > { %s13_s12 = sadd.s32 1, %s417_s12  }
  0xff   : > { %p10_p4 = scmp.ge.s32.totalorder %s13_s12, 4  }
 0x101   :  { %12 = sbr.rel (!%p10_p4) target bundleno = 1 (0x1), region = 62 }

</bundles_post_ra>
